<compile_context>
chip_gen: v5e
topology: v5e:2x2
jax: 0.10.0
libtpu: 0.0.40
codegen_flags: <defaults>
</compile_context>

<pallas_src>
import functools

import jax
import jax.numpy as jnp
from jax.experimental import pallas as pl
from jax.experimental.pallas import tpu as pltpu

LN_EPS = 1e-5  # nn.LayerNorm default


def _round_up(a: int, b: int) -> int:
    return (a + b - 1) // b * b


def _make_ffn_kernel(d_actual: int, d_pad: int):
    needs_mask = d_actual != d_pad
    inv_d = 1.0 / float(d_actual)

    def ffn_kernel(x_ref, w1t_ref, b1_ref, w2t_ref, b2_ref, g_ref, beta_ref, o_ref):
        # x_ref: (tm, Dp) f32 ; w1t_ref: (Dp, Fp) bf16 ; w2t_ref: (Fp, Dp) bf16
        x_f32 = x_ref[...]                       # keep f32 copy for residual + LN
        x_bf = x_f32.astype(jnp.bfloat16)        # MXU operand

        # Hoisted small operands (broadcast implicitly in the adds/muls below).
        b1 = b1_ref[...]
        b2 = b2_ref[...]
        g = g_ref[...]
        be = beta_ref[...]

        # w1 (1x1 conv == pointwise linear) + ReLU -- bf16 in, f32 accumulate.
        h = jnp.dot(x_bf, w1t_ref[...], preferred_element_type=jnp.float32) + b1
        h = jnp.maximum(h, 0.0).astype(jnp.bfloat16)

        # w2 (1x1 conv == pointwise linear) -- bf16 in, f32 accumulate.
        y = jnp.dot(h, w2t_ref[...], preferred_element_type=jnp.float32) + b2

        # dropout(p=0.0) is identity; residual + LayerNorm over the real model_dim.
        r = x_f32 + y                            # padded feature lanes of r are exactly 0
        mean = jnp.sum(r, axis=-1, keepdims=True) * inv_d
        c = r - mean
        if needs_mask:
            col = jax.lax.broadcasted_iota(jnp.int32, r.shape, 1)
            c = jnp.where(col < d_actual, c, 0.0)
        var = jnp.sum(c * c, axis=-1, keepdims=True) * inv_d
        norm = c * jax.lax.rsqrt(var + LN_EPS)
        o_ref[...] = (norm * g + be).astype(o_ref.dtype)

    return ffn_kernel


def positional_wise_feed_forward(x, w1, b1, w2, b2, gamma, beta, *, tm=256):
    """x: (B, L, model_dim); w1: (ffn_dim, model_dim); w2: (model_dim, ffn_dim)."""
    B, L, D = x.shape
    F = w1.shape[0]
    N = B * L

    LANE = 128
    Dp = _round_up(D, LANE)
    Fp = _round_up(F, LANE)

    # Row tile: as large as requested, but never larger than the (8-rounded) row count.
    tm = max(8, min(tm, _round_up(N, 8)))
    Np = _round_up(N, tm)

    x2 = x.reshape(N, D).astype(jnp.float32)
    if Np != N or Dp != D:
        x2 = jnp.pad(x2, ((0, Np - N), (0, Dp - D)))

    # Zero-pad weights / biases / LN params so padded lanes contribute nothing,
    # and cast weights to bf16 once here (MXU operands).
    w1t = jnp.pad(w1, ((0, Fp - F), (0, Dp - D))).T.astype(jnp.bfloat16)   # (Dp, Fp)
    w2t = jnp.pad(w2, ((0, Dp - D), (0, Fp - F))).T.astype(jnp.bfloat16)   # (Fp, Dp)
    b1_ = jnp.pad(b1, (0, Fp - F)).reshape(1, Fp).astype(jnp.float32)
    b2_ = jnp.pad(b2, (0, Dp - D)).reshape(1, Dp).astype(jnp.float32)
    g_ = jnp.pad(gamma, (0, Dp - D)).reshape(1, Dp).astype(jnp.float32)
    be_ = jnp.pad(beta, (0, Dp - D)).reshape(1, Dp).astype(jnp.float32)

    # Explicit VMEM budget from the real working set:
    #   resident bf16 weights (Buffered(1))  +  double-buffered x / out tiles
    #   +  (tm, Fp) f32 intermediate  +  small params  +  headroom.
    weight_bytes = 2 * (Dp * Fp) * 2
    io_tile_bytes = 2 * 2 * (tm * Dp * 4)      # x in + out, each double-buffered
    h_bytes = 2 * (tm * Fp * 4)
    small_bytes = (Fp + 3 * Dp) * 4
    vmem_limit = weight_bytes + io_tile_bytes + h_bytes + small_bytes + (8 << 20)
    vmem_limit = int(min(max(vmem_limit, 32 << 20), 100 << 20))

    kernel = _make_ffn_kernel(D, Dp)
    resident = functools.partial(pl.BlockSpec, pipeline_mode=pl.Buffered(1))

    out = pl.pallas_call(
        kernel,
        out_shape=jax.ShapeDtypeStruct((Np, Dp), x.dtype),
        grid_spec=pltpu.PrefetchScalarGridSpec(
            num_scalar_prefetch=0,
            grid=(Np // tm,),
            in_specs=[
                pl.BlockSpec((tm, Dp), lambda i: (i, 0)),        # x rows (pipelined)
                resident((Dp, Fp), lambda i: (0, 0)),            # w1^T (resident)
                resident((1, Fp), lambda i: (0, 0)),             # b1
                resident((Fp, Dp), lambda i: (0, 0)),            # w2^T (resident)
                resident((1, Dp), lambda i: (0, 0)),             # b2
                resident((1, Dp), lambda i: (0, 0)),             # LN gamma
                resident((1, Dp), lambda i: (0, 0)),             # LN beta
            ],
            out_specs=pl.BlockSpec((tm, Dp), lambda i: (i, 0)),
        ),
        compiler_params=pltpu.CompilerParams(
            dimension_semantics=("parallel",),
            vmem_limit_bytes=vmem_limit,
        ),
    )(x2, w1t, b1_, w2t, b2_, g_, be_)

    return out[:N, :D].reshape(B, L, D)


if __name__ == "__main__":
    # Small shapes consistent with the module's forward: (batch, seq, model_dim)
    B, L, model_dim, ffn_dim = 2, 8, 32, 64

    key = jax.random.PRNGKey(0)
    kx, k1, kb1, k2, kb2 = jax.random.split(key, 5)

    x = jax.random.normal(kx, (B, L, model_dim), dtype=jnp.float32)

    # Conv1d(model_dim, ffn_dim, 1) weight -> (ffn_dim, model_dim) after squeezing kernel dim
    w1 = jax.random.normal(k1, (ffn_dim, model_dim), dtype=jnp.float32) * 0.05
    b1 = jax.random.normal(kb1, (ffn_dim,), dtype=jnp.float32) * 0.05
    # Conv1d(ffn_dim, model_dim, 1) weight -> (model_dim, ffn_dim)
    w2 = jax.random.normal(k2, (model_dim, ffn_dim), dtype=jnp.float32) * 0.05
    b2 = jax.random.normal(kb2, (model_dim,), dtype=jnp.float32) * 0.05
    # LayerNorm(model_dim) params (PyTorch defaults: ones / zeros)
    gamma = jnp.ones((model_dim,), dtype=jnp.float32)
    beta = jnp.zeros((model_dim,), dtype=jnp.float32)

    out = positional_wise_feed_forward(x, w1, b1, w2, b2, gamma, beta)
    out = jax.block_until_ready(out)

    # Pure-JAX reference using the same precision strategy
    # (bf16 matmul operands, f32 accumulation, f32 residual + LayerNorm).
    xb = x.astype(jnp.bfloat16)
    w1b = w1.astype(jnp.bfloat16)
    w2b = w2.astype(jnp.bfloat16)
    h_ref = jnp.maximum(
        jnp.einsum("bld,fd->blf", xb, w1b, preferred_element_type=jnp.float32) + b1, 0.0
    )
    y_ref = (
        jnp.einsum("blf,df->bld", h_ref.astype(jnp.bfloat16), w2b,
                   preferred_element_type=jnp.float32) + b2
    )
    r_ref = x + y_ref
    mu = jnp.mean(r_ref, axis=-1, keepdims=True)
    var = jnp.mean((r_ref - mu) ** 2, axis=-1, keepdims=True)
    ref = (r_ref - mu) * jax.lax.rsqrt(var + LN_EPS) * gamma + beta

    assert jnp.allclose(out, ref, atol=1e-4, rtol=1e-4), (
        float(jnp.max(jnp.abs(out - ref)))
    )

    print("KERNEL_OK")
</pallas_src>

<mosaic_0001>
module attributes {stable_mosaic.version = 11 : i64} {
  func.func @ffn_kernel(%arg0: i32, %arg1: memref<16x128xf32, #tpu.memory_space<vmem>>, %arg2: memref<128x128xbf16, #tpu.memory_space<vmem>>, %arg3: memref<1x128xf32, #tpu.memory_space<vmem>>, %arg4: memref<128x128xbf16, #tpu.memory_space<vmem>>, %arg5: memref<1x128xf32, #tpu.memory_space<vmem>>, %arg6: memref<1x128xf32, #tpu.memory_space<vmem>>, %arg7: memref<1x128xf32, #tpu.memory_space<vmem>>, %arg8: memref<16x128xf32, #tpu.memory_space<vmem>>) attributes {dimension_semantics = [#tpu.dimension_semantics<parallel>], iteration_bounds = array<i64: 1>, scalar_prefetch = 0 : i64, scratch_operands = 0 : i64, tpu.core_type = #tpu.core_type<tc>, window_params = [{transform_indices = @transform_0, window_bounds = array<i64: 16, 128>}, {pipeline_mode = #tpu.pipeline_mode<synchronous>, transform_indices = @transform_1, window_bounds = array<i64: 128, 128>}, {pipeline_mode = #tpu.pipeline_mode<synchronous>, transform_indices = @transform_2, window_bounds = array<i64: 1, 128>}, {pipeline_mode = #tpu.pipeline_mode<synchronous>, transform_indices = @transform_3, window_bounds = array<i64: 128, 128>}, {pipeline_mode = #tpu.pipeline_mode<synchronous>, transform_indices = @transform_4, window_bounds = array<i64: 1, 128>}, {pipeline_mode = #tpu.pipeline_mode<synchronous>, transform_indices = @transform_5, window_bounds = array<i64: 1, 128>}, {pipeline_mode = #tpu.pipeline_mode<synchronous>, transform_indices = @transform_6, window_bounds = array<i64: 1, 128>}, {transform_indices = @transform_7, window_bounds = array<i64: 16, 128>}]} {
    %c0 = arith.constant 0 : index
    %c0_0 = arith.constant 0 : index
    %0 = vector.load %arg1[%c0, %c0_0] : memref<16x128xf32, #tpu.memory_space<vmem>>, vector<16x128xf32>
    %1 = arith.truncf %0 : vector<16x128xf32> to vector<16x128xbf16>
    %c0_1 = arith.constant 0 : index
    %c0_2 = arith.constant 0 : index
    %2 = vector.load %arg3[%c0_1, %c0_2] : memref<1x128xf32, #tpu.memory_space<vmem>>, vector<1x128xf32>
    %c0_3 = arith.constant 0 : index
    %c0_4 = arith.constant 0 : index
    %3 = vector.load %arg5[%c0_3, %c0_4] : memref<1x128xf32, #tpu.memory_space<vmem>>, vector<1x128xf32>
    %c0_5 = arith.constant 0 : index
    %c0_6 = arith.constant 0 : index
    %4 = vector.load %arg6[%c0_5, %c0_6] : memref<1x128xf32, #tpu.memory_space<vmem>>, vector<1x128xf32>
    %c0_7 = arith.constant 0 : index
    %c0_8 = arith.constant 0 : index
    %5 = vector.load %arg7[%c0_7, %c0_8] : memref<1x128xf32, #tpu.memory_space<vmem>>, vector<1x128xf32>
    %c0_9 = arith.constant 0 : index
    %c0_10 = arith.constant 0 : index
    %6 = vector.load %arg2[%c0_9, %c0_10] : memref<128x128xbf16, #tpu.memory_space<vmem>>, vector<128x128xbf16>
    %cst = arith.constant dense<0.000000e+00> : vector<16x128xf32>
    %7 = tpu.matmul %1, %6, %cst {dimension_numbers = #tpu.dot_dimension_numbers<[1], [0], [0], [1], [0, 0, 1, 1], [], []>} : vector<16x128xbf16>, vector<128x128xbf16>, vector<16x128xf32> -> vector<16x128xf32>
    %8 = vector.broadcast %2 : vector<1x128xf32> to vector<16x128xf32>
    %9 = arith.addf %7, %8 : vector<16x128xf32>
    %cst_11 = arith.constant 0.000000e+00 : f32
    %10 = vector.broadcast %cst_11 : f32 to vector<16x128xf32>
    %11 = arith.maximumf %9, %10 : vector<16x128xf32>
    %12 = arith.truncf %11 : vector<16x128xf32> to vector<16x128xbf16>
    %c0_12 = arith.constant 0 : index
    %c0_13 = arith.constant 0 : index
    %13 = vector.load %arg4[%c0_12, %c0_13] : memref<128x128xbf16, #tpu.memory_space<vmem>>, vector<128x128xbf16>
    %cst_14 = arith.constant dense<0.000000e+00> : vector<16x128xf32>
    %14 = tpu.matmul %12, %13, %cst_14 {dimension_numbers = #tpu.dot_dimension_numbers<[1], [0], [0], [1], [0, 0, 1, 1], [], []>} : vector<16x128xbf16>, vector<128x128xbf16>, vector<16x128xf32> -> vector<16x128xf32>
    %15 = vector.broadcast %3 : vector<1x128xf32> to vector<16x128xf32>
    %16 = arith.addf %14, %15 : vector<16x128xf32>
    %17 = arith.addf %0, %16 : vector<16x128xf32>
    %cst_15 = arith.constant dense<0.000000e+00> : vector<16xf32>
    %18 = vector.multi_reduction <add>, %17, %cst_15 [1] : vector<16x128xf32> to vector<16xf32>
    %19 = vector.shape_cast %18 : vector<16xf32> to vector<16x1xf32>
    %cst_16 = arith.constant 3.125000e-02 : f32
    %20 = vector.broadcast %cst_16 : f32 to vector<16x1xf32>
    %21 = arith.mulf %19, %20 : vector<16x1xf32>
    %22 = vector.broadcast %21 : vector<16x1xf32> to vector<16x128xf32>
    %23 = arith.subf %17, %22 : vector<16x128xf32>
    %24 = tpu.iota {dimensions = array<i32: 1>} : vector<16x128xi32>
    %c32_i32 = arith.constant 32 : i32
    %25 = vector.broadcast %c32_i32 : i32 to vector<16x128xi32>
    %26 = arith.cmpi slt, %24, %25 : vector<16x128xi32>
    %cst_17 = arith.constant 0.000000e+00 : f32
    %27 = vector.broadcast %cst_17 : f32 to vector<16x128xf32>
    %28 = arith.select %26, %23, %27 : vector<16x128xi1>, vector<16x128xf32>
    %29 = arith.mulf %28, %28 : vector<16x128xf32>
    %cst_18 = arith.constant dense<0.000000e+00> : vector<16xf32>
    %30 = vector.multi_reduction <add>, %29, %cst_18 [1] : vector<16x128xf32> to vector<16xf32>
    %31 = vector.shape_cast %30 : vector<16xf32> to vector<16x1xf32>
    %cst_19 = arith.constant 3.125000e-02 : f32
    %32 = vector.broadcast %cst_19 : f32 to vector<16x1xf32>
    %33 = arith.mulf %31, %32 : vector<16x1xf32>
    %cst_20 = arith.constant 9.99999974E-6 : f32
    %34 = vector.broadcast %cst_20 : f32 to vector<16x1xf32>
    %35 = arith.addf %33, %34 : vector<16x1xf32>
    %36 = math.rsqrt %35 : vector<16x1xf32>
    %37 = vector.broadcast %36 : vector<16x1xf32> to vector<16x128xf32>
    %38 = arith.mulf %28, %37 : vector<16x128xf32>
    %39 = vector.broadcast %4 : vector<1x128xf32> to vector<16x128xf32>
    %40 = arith.mulf %38, %39 : vector<16x128xf32>
    %41 = vector.broadcast %5 : vector<1x128xf32> to vector<16x128xf32>
    %42 = arith.addf %40, %41 : vector<16x128xf32>
    %c0_21 = arith.constant 0 : index
    %c0_22 = arith.constant 0 : index
    %43 = vector.load %arg8[%c0_21, %c0_22] : memref<16x128xf32, #tpu.memory_space<vmem>>, vector<16x128xf32>
    tpu.vector_store %arg8[%c0_21, %c0_22], %42 {strides = array<i32>} : memref<16x128xf32, #tpu.memory_space<vmem>>, vector<16x128xf32>,
    return
  }
  func.func @transform_0(%arg0: i32) -> (i32, i32) {
    %c0_i32 = arith.constant 0 : i32
    %c0_i32_0 = arith.constant 0 : i32
    return %arg0, %c0_i32 : i32, i32
  }
  func.func @transform_1(%arg0: i32) -> (i32, i32) {
    %c0_i32 = arith.constant 0 : i32
    %c0_i32_0 = arith.constant 0 : i32
    %c0_i32_1 = arith.constant 0 : i32
    return %c0_i32, %c0_i32_0 : i32, i32
  }
  func.func @transform_2(%arg0: i32) -> (i32, i32) {
    %c0_i32 = arith.constant 0 : i32
    %c0_i32_0 = arith.constant 0 : i32
    %c0_i32_1 = arith.constant 0 : i32
    return %c0_i32, %c0_i32_0 : i32, i32
  }
  func.func @transform_3(%arg0: i32) -> (i32, i32) {
    %c0_i32 = arith.constant 0 : i32
    %c0_i32_0 = arith.constant 0 : i32
    %c0_i32_1 = arith.constant 0 : i32
    return %c0_i32, %c0_i32_0 : i32, i32
  }
  func.func @transform_4(%arg0: i32) -> (i32, i32) {
    %c0_i32 = arith.constant 0 : i32
    %c0_i32_0 = arith.constant 0 : i32
    %c0_i32_1 = arith.constant 0 : i32
    return %c0_i32, %c0_i32_0 : i32, i32
  }
  func.func @transform_5(%arg0: i32) -> (i32, i32) {
    %c0_i32 = arith.constant 0 : i32
    %c0_i32_0 = arith.constant 0 : i32
    %c0_i32_1 = arith.constant 0 : i32
    return %c0_i32, %c0_i32_0 : i32, i32
  }
  func.func @transform_6(%arg0: i32) -> (i32, i32) {
    %c0_i32 = arith.constant 0 : i32
    %c0_i32_0 = arith.constant 0 : i32
    %c0_i32_1 = arith.constant 0 : i32
    return %c0_i32, %c0_i32_0 : i32, i32
  }
  func.func @transform_7(%arg0: i32) -> (i32, i32) {
    %c0_i32 = arith.constant 0 : i32
    %c0_i32_0 = arith.constant 0 : i32
    return %arg0, %c0_i32 : i32, i32
  }
}

</mosaic_0001>

<bundles_post_ra>
// kernel: tpu_custom_call.1
= control target key start
LH: loop header
LB: loop body
LE: loop exit
PB: predicated region body
PF: predicated region fallthrough
CT: control target
= control target key end

     0   :  { %12 = vsyncpa [#allocation3], 0  ;;  %s601_s0 = inlined_call_operand.hbm [shape: f32[16,128], index: 0, kind: input, shape index: {}]   ;;  %s602_s1 = inlined_call_operand.hbm [shape: bf16[128,128], index: 1, kind: input, shape index: {}]   ;;  %s603_s2 = inlined_call_operand.vmem [shape: f32[1,128], index: 2, kind: input, shape index: {}]   ;;  %s604_s3 = inlined_call_operand.hbm [shape: bf16[128,128], index: 3, kind: input, shape index: {}]   ;;  %s605_s4 = inlined_call_operand.vmem [shape: f32[1,128], index: 4, kind: input, shape index: {}]   ;;  %s606_s5 = inlined_call_operand.vmem [shape: f32[1,128], index: 5, kind: input, shape index: {}]   ;;  %s607_s6 = inlined_call_operand.vmem [shape: f32[1,128], index: 6, kind: input, shape index: {}]   ;;  %s608_s7 = inlined_call_operand.hbm [shape: f32[16,128], index: 7, kind: output, shape index: {}]  }
   0x1   :  { %13 = vsyncpa [#allocation6], 0  ;;  %s32_s26 = sshll.u32 %s602_s1, 4  ;;  %s33_s26 = int_to_ptr.hbm [resolvable:$true] %s32_s26 }
   0x2   :  { %14 = vsyncpa [#allocation4], 0  ;;  %s523_s27 = smov [#allocation5]   ;;  %s19_s8 = sshll.u32 %s601_s0, 4  ;;  %s20_s8 = int_to_ptr.hbm [resolvable:$true] %s19_s8 }
   0x3   :  { %s34_s28 = sshll.u32 %s523_s27, 4  ;;  %s524_s9 = smov 64   ;;  %s35_s28 = int_to_ptr.vmem [resolvable:$true] %s34_s28 }
   0x4   :  { %s525_s10 = smov 4   ;;  %s526_s11 = smov [#allocation2]  }
   0x5   :  { %40 = dma.hbm_to_vmem [thread:$0]  %s33_s26, 1024, %s35_s28, [#allocation6], %s524_s9, %s524_s9, %s525_s10  }
   0x6   :  { %s21_s12 = sshll.u32 %s526_s11, 4  ;;  %s527_s13 = smov 128   ;;  %s22_s12 = int_to_ptr.vmem [resolvable:$true] %s21_s12 }
   0x7   :  { %s528_s14 = smov 8   ;;  %s47_s16 = sshll.u32 %s604_s3, 4  ;;  %s48_s16 = int_to_ptr.hbm [resolvable:$true] %s47_s16 }
   0x8   :  { %27 = dma.hbm_to_vmem [thread:$0]  %s20_s8, 256, %s22_s12, [#allocation3], %s527_s13, %s527_s13, %s528_s14  }
   0x9   :  { %s529_s17 = smov [#allocation7]  }
   0xa   :  { %s49_s0 = sshll.u32 %s529_s17, 4  ;;  %s50_s0 = int_to_ptr.vmem [resolvable:$true] %s49_s0 }
   0xb   :  { %55 = dma.hbm_to_vmem [thread:$0]  %s48_s16, 1024, %s50_s0, [#allocation6], %s524_s9, %s524_s9, %s525_s10  }
   0xc   :  { %517 = dma.done.wait [#allocation3], 256  }
   0xd   :  { %518 = vsyncadd [#allocation3], 4294967040 }
   0xe   :  { %519 = dma.done.wait [#allocation6], 2048  }
   0xf   :  { %520 = vsyncadd [#allocation6], 4294965248  ;;  %v396_v0 = vld [vmem:[#allocation5 + $0x38] sm:$0xff]  ;;  %v395_v1 = vld [vmem:[#allocation5 + $0x30] sm:$0xff]  ;;  %v256_v34 = vlaneseq  ;;  %s530_s23 = smov [#allocation8]   ;;  %s311_s26 = sshll.u32 %s608_s7, 4  ;;  %s312_s26 = int_to_ptr.hbm [resolvable:$true] %s311_s26 }
  0x10   :  { %148 = vmatpush.bf16.msra.mxu0 %v396_v0  ;;  %v404_v2 = vld [vmem:[#allocation7 + $0x38] sm:$0xff]  ;;  %v403_v3 = vld [vmem:[#allocation7 + $0x30] sm:$0xff]  ;;  %v394_v4 = vld [vmem:[#allocation5 + $0x28] sm:$0xff] }
  0x11   :  { %232 = vmatpush.bf16.msra.mxu1 %v404_v2  ;;  %v402_v5 = vld [vmem:[#allocation7 + $0x28] sm:$0xff]  ;;  %v393_v6 = vld [vmem:[#allocation5 + $0x20] sm:$0xff]  ;;  %v392_v8 = vld [vmem:[#allocation5 + $0x18] sm:$0xff]  ;;  %v257_v35 = vand.u32 127, %v256_v34 }
  0x12   :  { %v401_v7 = vld [vmem:[#allocation7 + $0x20] sm:$0xff]  ;;  %v391_v9 = vld [vmem:[#allocation5 + $0x10] sm:$0xff]  ;;  %v390_v10 = vld [vmem:[#allocation5 + $0x8] sm:$0xff] }
  0x13   :  { %v389_v11 = vld [vmem:[#allocation5] sm:$0xff]  ;;  %v74_v12 = vld [vmem:[#allocation2] sm:$0xff]  ;;  %v75_v13 = vld [vmem:[#allocation2 + $0x8] sm:$0xff]  ;;  %vm258_vm0 = vcmp.lt.s32.totalorder %v257_v35, 32 }
  0x14   :  { %149 = vmatpush.bf16.msra.mxu0 %v395_v1  ;;  %v76_v14 = vpack.c.bf16 %v75_v13, %v74_v12  ;;  %v400_v15 = vld [vmem:[#allocation7 + $0x18] sm:$0xff]  ;;  %v399_v16 = vld [vmem:[#allocation7 + $0x10] sm:$0xff]  ;;  %v398_v17 = vld [vmem:[#allocation7 + $0x8] sm:$0xff] }
  0x15   :  { %233 = vmatpush.bf16.msra.mxu1 %v403_v3  ;;  %v397_v18 = vld [vmem:[#allocation7] sm:$0xff]  ;;  %v413_v20 = vld [vmem:[%s603_s2] ss:$0 sm:$0xff] }
  0x16   :  { %v414_v27 = vld [vmem:[%s605_s4] ss:$0 sm:$0xff] }
  0x17   :  { %v415_v60 = vld [vmem:[%s606_s5] ss:$0 sm:$0xff]  ;;  %s309_s5 = sshll.u32 %s530_s23, 4  ;;  %s310_s5 = int_to_ptr.vmem [resolvable:$true] %s309_s5 }
  0x18   :  { %150 = vmatpush.bf16.msra.mxu0 %v394_v4  ;;  %v416_v0 = vld [vmem:[%s607_s6] ss:$0 sm:$0xff] }
  0x19   :  { %234 = vmatpush.bf16.msra.mxu1 %v402_v5 }
  0x1c   :  { %151 = vmatpush.bf16.msra.mxu0 %v393_v6 }
  0x1d   :  { %235 = vmatpush.bf16.msra.mxu1 %v401_v7 }
  0x20   :  { %152 = vmatpush.bf16.msra.mxu0 %v392_v8 }
  0x21   :  { %236 = vmatpush.bf16.msra.mxu1 %v400_v15 }
  0x24   :  { %153 = vmatpush.bf16.msra.mxu0 %v391_v9 }
  0x25   :  { %237 = vmatpush.bf16.msra.mxu1 %v399_v16 }
  0x28   :  { %154 = vmatpush.bf16.msra.mxu0 %v390_v10 }
  0x29   :  { %238 = vmatpush.bf16.msra.mxu1 %v398_v17 }
  0x2c   :  { %155 = vmatpush.bf16.msra.mxu0 %v389_v11 }
  0x2d   :  { %239 = vmatpush.bf16.msra.mxu1 %v397_v18 }
  0x2f   :  { %156 = vmatmul.bf16.vlgmr.msra.gmra.mxu0 %v76_v14 }
  0xac   :  { %v157_v19 = vpop.f32.mrf.mxu0 }
  0xad   :  { %v158_v21 = vadd.f32 %v413_v20, %v157_v19 }
  0xaf   :  { %v162_v24 = vmax.f32 %v158_v21, 0.0 }
  0xb4   :  { %v159_v22 = vpop.f32.mrf.mxu0 }
  0xb5   :  { %v160_v23 = vadd.f32 %v413_v20, %v159_v22 }
  0xb7   :  { %v163_v25 = vmax.f32 %v160_v23, 0.0 }
  0xb9   :  { %v164_v26 = vpack.c.bf16 %v163_v25, %v162_v24 }
  0xbb   :  { %240 = vmatmul.bf16.vlgmr.msra.gmra.mxu1 %v164_v26 }
 0x138   :  { %v241_v28 = vpop.f32.mrf.mxu1 }
 0x139   :  { %v242_v29 = vadd.f32 %v414_v27, %v241_v28 }
 0x13b   :  { %v246_v30 = vadd.f32 %v242_v29, %v74_v12 }
 0x13d   :  { %248 = vadd.xlane.f32.xlu0 %v246_v30 }
 0x140   :  { %v243_v31 = vpop.f32.mrf.mxu1 }
 0x141   :  { %v244_v32 = vadd.f32 %v414_v27, %v243_v31 }
 0x143   :  { %v247_v33 = vadd.f32 %v244_v32, %v75_v13 }
 0x145   :  { %250 = vadd.xlane.f32.xlu0 %v247_v33 }
 0x1b0   :  { %v249_v36 = vpop.xlane.xlu0 %248 }
 0x1b1   :  { %v252_v37 = vmul.f32 0.03125, %v249_v36 }
 0x1b3   :  { %v254_v38 = vsub.f32 %v246_v30, %v252_v37 }
 0x1b5   :  { %v259_v39 = vsel %vm258_vm0, %v254_v38, 0.0 }
 0x1b6   :  { %v261_v40 = vmul.f32 %v259_v39, %v259_v39 }
 0x1b8   :  { %263 = vadd.xlane.f32.xlu1 %v261_v40  ;;  %v251_v41 = vpop.xlane.xlu0 %250 }
 0x1b9   :  { %v253_v42 = vmul.f32 0.03125, %v251_v41 }
 0x1bb   :  { %v255_v43 = vsub.f32 %v247_v33, %v253_v42 }
 0x1bd   :  { %v260_v44 = vsel %vm258_vm0, %v255_v43, 0.0 }
 0x1be   :  { %v262_v45 = vmul.f32 %v260_v44, %v260_v44 }
 0x1c0   :  { %265 = vadd.xlane.f32.xlu1 %v262_v45 }
 0x22b   :  { %v264_v46 = vpop.xlane.xlu1 %263 }
 0x22c   :  { %v267_v47 = vmul.f32 0.03125, %v264_v46 }
 0x22e   :  { %v269_v48 = vadd.f32 1e-05, %v267_v47 }
 0x230   :  { %417 = vrsqrt.f32 %v269_v48  ;;  %vm277_vm2 = vweird.f32 %v269_v48 }
 0x233   :  { %v266_v49 = vpop.xlane.xlu1 %265 }
 0x234   :  { %v268_v50 = vmul.f32 0.03125, %v266_v49 }
 0x236   :  { %v418_v51 = vpop.eup %417  ;;  %v270_v52 = vadd.f32 1e-05, %v268_v50 }
 0x237   :  { %v272_v53 = vmul.f32 %v418_v51, %v269_v48  ;;  %vm278_vm1 = vweird.f32 %v418_v51 }
 0x238   :  { %419 = vrsqrt.f32 %v270_v52  ;;  %vm279_vm3 = vmor %vm277_vm2, %vm278_vm1  ;;  %vm287_vm5 = vweird.f32 %v270_v52 }
 0x239   :  { %v273_v54 = vmul.f32 %v418_v51, %v272_v53 }
 0x23b   :  { %v274_v55 = vmul.f32 0.5, %v273_v54 }
 0x23d   :  { %v275_v56 = vsub.f32 1.5, %v274_v55 }
 0x23e   :  { %v420_v57 = vpop.eup %419 }
 0x23f   :  { %v276_v58 = vmul.f32 %v418_v51, %v275_v56  ;;  %v282_v59 = vmul.f32 %v420_v57, %v270_v52  ;;  %vm288_vm4 = vweird.f32 %v420_v57 }
 0x240   :  { %vm289_vm6 = vmor %vm287_vm5, %vm288_vm4 }
 0x241   :  { %v280_v61 = vsel %vm279_vm3, %v418_v51, %v276_v58  ;;  %v283_v62 = vmul.f32 %v420_v57, %v282_v59 }
 0x242   :  { %v291_v63 = vmul.f32 %v280_v61, %v259_v39 }
 0x243   :  { %v284_v1 = vmul.f32 0.5, %v283_v62 }
 0x244   :  { %v296_v2 = vmul.f32 %v415_v60, %v291_v63 }
 0x245   :  { %v285_v3 = vsub.f32 1.5, %v284_v1 }
 0x246   :  { %v301_v4 = vadd.f32 %v416_v0, %v296_v2 }
 0x247   :  { %v286_v5 = vmul.f32 %v420_v57, %v285_v3 }
 0x248   :  { %303 = vst [vmem:[#allocation8] sm:$0xff] %v301_v4 }
 0x249   :  { %v290_v6 = vsel %vm289_vm6, %v420_v57, %v286_v5 }
 0x24a   :  { %v292_v7 = vmul.f32 %v290_v6, %v260_v44 }
 0x24c   :  { %v297_v8 = vmul.f32 %v415_v60, %v292_v7 }
 0x24e   :  { %v302_v9 = vadd.f32 %v416_v0, %v297_v8 }
 0x250   :  { %304 = vst [vmem:[#allocation8 + $0x8] sm:$0xff] %v302_v9 }
 0x251   :  { %317 = dma.vmem_to_hbm [thread:$0]  %s310_s5, 256, %s312_s26, [#allocation4], %s527_s13, %s527_s13, %s528_s14  }
 0x252   :  { %521 = dma.done.wait [#allocation4], 256  }
 0x253   :  { %522 = vsyncadd [#allocation4], 4294967040 }
 0x254   :  { %322 = vsyncpa [#allocation3], 1 }
 0x255   :  { %323 = vsyncpa [#allocation6], 1 }
 0x256   :  { %324 = vsyncpa [#allocation4], 1 }

</bundles_post_ra>
